<compile_context>
chip_gen: v7x
topology: tpu7x:2x2x1
jax: 0.10.0
libtpu: 0.0.40
codegen_flags: <defaults>
</compile_context>

<pallas_src>
import functools

import jax
import jax.numpy as jnp
from jax.experimental import pallas as pl
from jax.experimental.pallas import tpu as pltpu


# ----------------------------- kernel --------------------------------------- #

def _mlm_partial_kernel(logits_ref, tgt_ref, w_ref, out_ref,
                        m_ref, l_ref, t_ref, *, v_total, ragged_v):
    """One (row-tile, vocab-chunk) step of the masked-LM cross-entropy.

    Online logsumexp over the vocab-chunk grid axis (axis 1); at the last
    chunk, emits the per-row-tile partial sums (sum(ce*w), sum(w)) as a
    lane-dense (1, 8, 128) block.
    """
    j = pl.program_id(1)
    nv = pl.num_programs(1)
    tile_rows, vc = logits_ref.shape

    @pl.when(j == 0)
    def _init():
        m_ref[...] = jnp.full_like(m_ref, -jnp.inf)
        l_ref[...] = jnp.zeros_like(l_ref)
        t_ref[...] = jnp.zeros_like(t_ref)

    logits = logits_ref[...]                                    # native dtype
    col = jax.lax.broadcasted_iota(jnp.int32, (tile_rows, vc), 1)  # local col

    if ragged_v:
        # Last vocab chunk over-reads columns >= V; mask them (in native dtype)
        # so they can never contribute to max / sum-of-exp.
        v_rem = v_total - j * vc
        logits = jnp.where(col < v_rem, logits,
                           jnp.asarray(-jnp.inf, dtype=logits.dtype))

    # Row max in the native dtype (exact & monotone); cast only the (tile, 1).
    m_chunk = jnp.max(logits, axis=-1, keepdims=True).astype(jnp.float32)
    m_prev = m_ref[...]
    m_new = jnp.maximum(m_prev, m_chunk)
    alpha = jnp.exp(m_prev - m_new)                             # (tile, 1)

    shifted = logits.astype(jnp.float32) - m_new                # (tile, vc) f32
    l_ref[...] = alpha * l_ref[...] + jnp.sum(jnp.exp(shifted),
                                              axis=-1, keepdims=True)

    # Gather the (shifted) target logit of this chunk; add m_new back only when
    # the target column actually lives in this chunk.
    tgt_local = tgt_ref[...] - j * vc                           # (tile, 1) i32
    t_shift = jnp.sum(jnp.where(col == tgt_local, shifted, 0.0),
                      axis=-1, keepdims=True)
    in_chunk = jnp.logical_and(tgt_local >= 0, tgt_local < vc)
    t_ref[...] += t_shift + jnp.where(in_chunk, m_new, 0.0)
    m_ref[...] = m_new

    @pl.when(j == nv - 1)
    def _finalize():
        ce = m_ref[...] + jnp.log(l_ref[...]) - t_ref[...]      # (tile, 1)
        w = w_ref[...]
        # Padded / over-read rows carry w == 0; select kills any NaN/Inf there.
        ce = jnp.where(w > 0, ce, 0.0)
        num = jnp.sum(ce * w)
        den = jnp.sum(w)
        sub = jax.lax.broadcasted_iota(jnp.int32, (1, 8, 128), 1)
        lane = jax.lax.broadcasted_iota(jnp.int32, (1, 8, 128), 2)
        out_ref[...] = jnp.where((sub == 0) & (lane == 0), num,
                                 jnp.where((sub == 0) & (lane == 1), den, 0.0))


# ----------------------------- wrapper --------------------------------------- #

def _round_up(x, m):
    return (x + m - 1) // m * m


def _choose_tiling(n, v, itemsize, tile_n=None, v_chunk=None):
    """Pick (row tile, vocab chunk, #chunks, vmem_limit) against VMEM capacity."""
    try:
        vmem_cap = int(pltpu.get_tpu_info().vmem_capacity_bytes)
    except Exception:
        vmem_cap = 64 * 1024 * 1024  # conservative: v7x per-TC VMEM

    if vmem_cap >= (128 << 20):          # v5e / v6e: use the idle headroom
        vmem_limit = 100 << 20
        budget = 80 << 20
    else:                                # v7x: stay well under the 64 MiB ceiling
        vmem_limit = min(56 << 20, vmem_cap - (8 << 20))
        budget = max(16 << 20, vmem_limit - (16 << 20))

    # Vocab chunk: single pass for modest vocabs, else 2048-wide (multiple of 128).
    if v_chunk is not None:
        vc = int(v_chunk)
        vc = v if vc >= v else max(128, (vc // 128) * 128)
    else:
        vc = v if v <= 2048 else 2048
    num_vc = -(-v // vc)

    # Per-row VMEM: double-buffered native-dtype logits block + ~5 full-width
    # f32/i32 temporaries (cast/shift, exp, iota, gather select) + lane-padded
    # narrow blocks/scratch.
    per_row = vc * (2 * itemsize + 5 * 4) + 7 * 128 * 4
    if tile_n is None:
        tile = budget // per_row
        tile = max(16, min(1024, (tile // 16) * 16))   # bf16 sublane packing
    else:
        tile = max(8, (int(tile_n) // 8) * 8)
    tile = min(tile, _round_up(n, 8))

    return int(tile), int(vc), int(num_vc), int(vmem_limit)


def mn_loss(mlm_pred, nsp_pred, mlm_target, nsp_target, mlm_weights,
            *, tile_n=None, v_chunk=None):
    """Pallas implementation of MNLoss.forward (reduction='none')."""
    B, S, V = mlm_pred.shape
    N = B * S
    itemsize = jnp.dtype(mlm_pred.dtype).itemsize

    # Logits stay in their native dtype (bf16/f32) and are NOT padded/copied.
    mlm_logits = mlm_pred.reshape(N, V)
    mlm_tgt = mlm_target.reshape(N, 1).astype(jnp.int32)
    mlm_w = mlm_weights.reshape(N, 1).astype(jnp.float32)

    tile, vc, num_vc, vmem_limit = _choose_tiling(N, V, itemsize, tile_n, v_chunk)
    num_row_tiles = -(-N // tile)
    n_pad = num_row_tiles * tile
    if n_pad > N:
        # Pad only the tiny per-row arrays; padded rows carry weight 0.
        mlm_tgt = jnp.pad(mlm_tgt, ((0, n_pad - N), (0, 0)))
        mlm_w = jnp.pad(mlm_w, ((0, n_pad - N), (0, 0)))
    ragged_v = (V % vc) != 0

    kernel = functools.partial(_mlm_partial_kernel, v_total=V, ragged_v=ragged_v)

    cost = pl.CostEstimate(
        flops=int(8 * N * V),
        transcendentals=int(N * V + 2 * N),
        bytes_accessed=int(N * V * itemsize + n_pad * 8 + num_row_tiles * 4096),
    )

    partials = pl.pallas_call(
        kernel,
        out_shape=jax.ShapeDtypeStruct((num_row_tiles, 8, 128), jnp.float32),
        grid_spec=pltpu.PrefetchScalarGridSpec(
            num_scalar_prefetch=0,
            grid=(num_row_tiles, num_vc),
            in_specs=[
                pl.BlockSpec((tile, vc), lambda i, j: (i, j)),
                pl.BlockSpec((tile, 1), lambda i, j: (i, 0)),
                pl.BlockSpec((tile, 1), lambda i, j: (i, 0)),
            ],
            out_specs=pl.BlockSpec((1, 8, 128), lambda i, j: (i, 0, 0)),
            scratch_shapes=[
                pltpu.VMEM((tile, 1), jnp.float32),   # running max
                pltpu.VMEM((tile, 1), jnp.float32),   # running sum of exp
                pltpu.VMEM((tile, 1), jnp.float32),   # running target logit
            ],
        ),
        compiler_params=pltpu.CompilerParams(
            dimension_semantics=("parallel", "arbitrary"),
            vmem_limit_bytes=vmem_limit,
        ),
        cost_estimate=cost,
    )(mlm_logits, mlm_tgt, mlm_w)

    num = jnp.sum(partials[:, 0, 0])
    den = jnp.sum(partials[:, 0, 1])
    mlm_loss = num / (den + 1e-10)

    # NSP head: a few hundred FLOPs — plain JAX (fused by XLA) per perf review;
    # a dedicated pallas_call would cost more than the work itself.
    nsp_logp = jax.nn.log_softmax(nsp_pred.astype(jnp.float32), axis=-1)
    nsp_ce = -jnp.take_along_axis(
        nsp_logp, nsp_target[:, None].astype(jnp.int32), axis=-1)[:, 0]
    nsp_loss = jnp.mean(nsp_ce)

    return mlm_loss + nsp_loss


# ----------------------------- reference & test ----------------------------- #

def _reference(mlm_pred, nsp_pred, mlm_target, nsp_target, mlm_weights):
    mlm_logp = jax.nn.log_softmax(mlm_pred.astype(jnp.float32), axis=-1)
    mlm_ce = -jnp.take_along_axis(mlm_logp, mlm_target[..., None], axis=-1)[..., 0]
    mlm_w = mlm_weights.astype(jnp.float32)
    mlm_loss = jnp.sum(mlm_ce * mlm_w) / (jnp.sum(mlm_w) + 1e-10)
    nsp_logp = jax.nn.log_softmax(nsp_pred.astype(jnp.float32), axis=-1)
    nsp_ce = -jnp.take_along_axis(nsp_logp, nsp_target[:, None], axis=-1)[:, 0]
    return mlm_loss + jnp.mean(nsp_ce)


def _make_inputs(key, B, S, V, C, dtype):
    k1, k2, k3, k4, k5, key = jax.random.split(key, 6)
    mlm_pred = jax.random.normal(k1, (B, S, V), dtype=jnp.float32).astype(dtype)
    nsp_pred = jax.random.normal(k2, (B, C), dtype=jnp.float32).astype(dtype)
    mlm_target = jax.random.randint(k3, (B, S), 0, V, dtype=jnp.int32)
    nsp_target = jax.random.randint(k4, (B,), 0, C, dtype=jnp.int32)
    mlm_weights = (jax.random.uniform(k5, (B, S)) > 0.3).astype(jnp.float32)
    return (mlm_pred, nsp_pred, mlm_target, nsp_target, mlm_weights), key


if __name__ == "__main__":
    key = jax.random.PRNGKey(0)

    # --- Test 1: small f32, single row tile, single vocab chunk ------------- #
    args, key = _make_inputs(key, B=2, S=8, V=32, C=2, dtype=jnp.float32)
    loss = mn_loss(*args)
    jax.block_until_ready(loss)
    ref = _reference(*args)
    assert jnp.allclose(loss, ref, atol=1e-5, rtol=1e-5), (loss, ref)

    # --- Test 2: bf16, ragged last row tile (N=14, tile=8), 2 vocab chunks -- #
    args, key = _make_inputs(key, B=2, S=7, V=256, C=2, dtype=jnp.bfloat16)
    loss = mn_loss(*args, tile_n=8, v_chunk=128)
    jax.block_until_ready(loss)
    ref = _reference(*args)
    assert jnp.allclose(loss, ref, atol=1e-5, rtol=1e-4), (loss, ref)

    # --- Test 3: f32, ragged last vocab chunk (V=320, chunk=128) ------------ #
    args, key = _make_inputs(key, B=2, S=8, V=320, C=2, dtype=jnp.float32)
    loss = mn_loss(*args, tile_n=8, v_chunk=128)
    jax.block_until_ready(loss)
    ref = _reference(*args)
    assert jnp.allclose(loss, ref, atol=1e-5, rtol=1e-5), (loss, ref)

    # --- Test 4: default tiling path with auto vocab chunking (V > 2048) ---- #
    args, key = _make_inputs(key, B=2, S=8, V=4224, C=2, dtype=jnp.float32)
    loss = mn_loss(*args)
    jax.block_until_ready(loss)
    ref = _reference(*args)
    assert jnp.allclose(loss, ref, atol=1e-5, rtol=1e-5), (loss, ref)

    print("KERNEL_OK")
</pallas_src>

<mosaic_0001>
module attributes {stable_mosaic.version = 11 : i64} {
  func.func @_mlm_partial_kernel(%arg0: i32, %arg1: i32, %arg2: memref<16x32xf32, #tpu.memory_space<vmem>>, %arg3: memref<16x1xi32, #tpu.memory_space<vmem>>, %arg4: memref<16x1xf32, #tpu.memory_space<vmem>>, %arg5: memref<1x8x128xf32, #tpu.memory_space<vmem>>, %arg6: memref<16x1xf32, #tpu.memory_space<vmem>>, %arg7: memref<16x1xf32, #tpu.memory_space<vmem>>, %arg8: memref<16x1xf32, #tpu.memory_space<vmem>>) attributes {dimension_semantics = [#tpu.dimension_semantics<parallel>, #tpu.dimension_semantics<arbitrary>], iteration_bounds = array<i64: 1, 1>, scalar_prefetch = 0 : i64, scratch_operands = 3 : i64, tpu.core_type = #tpu.core_type<tc>, window_params = [{transform_indices = @transform_0, window_bounds = array<i64: 16, 32>}, {transform_indices = @transform_1, window_bounds = array<i64: 16, 1>}, {transform_indices = @transform_2, window_bounds = array<i64: 16, 1>}, {transform_indices = @transform_3, window_bounds = array<i64: 1, 8, 128>}]} {
    %c0_i32 = arith.constant 0 : i32
    %0 = arith.cmpi eq, %arg1, %c0_i32 : i32
    %1 = arith.extui %0 : i1 to i32
    %c0_i32_0 = arith.constant 0 : i32
    %2 = arith.cmpi ne, %1, %c0_i32_0 : i32
    scf.if %2 {
      %cst_24 = arith.constant 0xFF800000 : f32
      %45 = vector.broadcast %cst_24 : f32 to vector<16x1xf32>
      %c0_25 = arith.constant 0 : index
      %c0_26 = arith.constant 0 : index
      %46 = vector.load %arg6[%c0_25, %c0_26] : memref<16x1xf32, #tpu.memory_space<vmem>>, vector<16x1xf32>
      tpu.vector_store %arg6[%c0_25, %c0_26], %45 {strides = array<i32>} : memref<16x1xf32, #tpu.memory_space<vmem>>, vector<16x1xf32>,
      %cst_27 = arith.constant 0.000000e+00 : f32
      %47 = vector.broadcast %cst_27 : f32 to vector<16x1xf32>
      %c0_28 = arith.constant 0 : index
      %c0_29 = arith.constant 0 : index
      %48 = vector.load %arg7[%c0_28, %c0_29] : memref<16x1xf32, #tpu.memory_space<vmem>>, vector<16x1xf32>
      tpu.vector_store %arg7[%c0_28, %c0_29], %47 {strides = array<i32>} : memref<16x1xf32, #tpu.memory_space<vmem>>, vector<16x1xf32>,
      %cst_30 = arith.constant 0.000000e+00 : f32
      %49 = vector.broadcast %cst_30 : f32 to vector<16x1xf32>
      %c0_31 = arith.constant 0 : index
      %c0_32 = arith.constant 0 : index
      %50 = vector.load %arg8[%c0_31, %c0_32] : memref<16x1xf32, #tpu.memory_space<vmem>>, vector<16x1xf32>
      tpu.vector_store %arg8[%c0_31, %c0_32], %49 {strides = array<i32>} : memref<16x1xf32, #tpu.memory_space<vmem>>, vector<16x1xf32>,
    } else {
    }
    %c0 = arith.constant 0 : index
    %c0_1 = arith.constant 0 : index
    %3 = vector.load %arg2[%c0, %c0_1] : memref<16x32xf32, #tpu.memory_space<vmem>>, vector<16x32xf32>
    %4 = tpu.iota {dimensions = array<i32: 1>} : vector<16x32xi32>
    %cst = arith.constant dense<0xFF800000> : vector<16xf32>
    %5 = vector.multi_reduction <maximumf>, %3, %cst [1] : vector<16x32xf32> to vector<16xf32>
    %6 = vector.shape_cast %5 : vector<16xf32> to vector<16x1xf32>
    %c0_2 = arith.constant 0 : index
    %c0_3 = arith.constant 0 : index
    %7 = vector.load %arg6[%c0_2, %c0_3] : memref<16x1xf32, #tpu.memory_space<vmem>>, vector<16x1xf32>
    %8 = arith.maximumf %7, %6 : vector<16x1xf32>
    %9 = arith.subf %7, %8 : vector<16x1xf32>
    %10 = math.exp %9 : vector<16x1xf32>
    %11 = vector.broadcast %8 : vector<16x1xf32> to vector<16x32xf32>
    %12 = arith.subf %3, %11 : vector<16x32xf32>
    %c0_4 = arith.constant 0 : index
    %c0_5 = arith.constant 0 : index
    %13 = vector.load %arg7[%c0_4, %c0_5] : memref<16x1xf32, #tpu.memory_space<vmem>>, vector<16x1xf32>
    %14 = arith.mulf %10, %13 : vector<16x1xf32>
    %15 = math.exp %12 : vector<16x32xf32>
    %cst_6 = arith.constant dense<0.000000e+00> : vector<16xf32>
    %16 = vector.multi_reduction <add>, %15, %cst_6 [1] : vector<16x32xf32> to vector<16xf32>
    %17 = vector.shape_cast %16 : vector<16xf32> to vector<16x1xf32>
    %18 = arith.addf %14, %17 : vector<16x1xf32>
    %c0_7 = arith.constant 0 : index
    %c0_8 = arith.constant 0 : index
    %19 = vector.load %arg7[%c0_7, %c0_8] : memref<16x1xf32, #tpu.memory_space<vmem>>, vector<16x1xf32>
    tpu.vector_store %arg7[%c0_7, %c0_8], %18 {strides = array<i32>} : memref<16x1xf32, #tpu.memory_space<vmem>>, vector<16x1xf32>,
    %c0_9 = arith.constant 0 : index
    %c0_10 = arith.constant 0 : index
    %20 = vector.load %arg3[%c0_9, %c0_10] : memref<16x1xi32, #tpu.memory_space<vmem>>, vector<16x1xi32>
    %c32_i32 = arith.constant 32 : i32
    %21 = arith.muli %arg1, %c32_i32 : i32
    %22 = vector.broadcast %21 : i32 to vector<16x1xi32>
    %23 = arith.subi %20, %22 : vector<16x1xi32>
    %24 = vector.broadcast %23 : vector<16x1xi32> to vector<16x32xi32>
    %25 = arith.cmpi eq, %4, %24 : vector<16x32xi32>
    %cst_11 = arith.constant 0.000000e+00 : f32
    %26 = vector.broadcast %cst_11 : f32 to vector<16x32xf32>
    %27 = arith.select %25, %12, %26 : vector<16x32xi1>, vector<16x32xf32>
    %cst_12 = arith.constant dense<0.000000e+00> : vector<16xf32>
    %28 = vector.multi_reduction <add>, %27, %cst_12 [1] : vector<16x32xf32> to vector<16xf32>
    %29 = vector.shape_cast %28 : vector<16xf32> to vector<16x1xf32>
    %c0_i32_13 = arith.constant 0 : i32
    %30 = vector.broadcast %c0_i32_13 : i32 to vector<16x1xi32>
    %31 = arith.cmpi sge, %23, %30 : vector<16x1xi32>
    %c32_i32_14 = arith.constant 32 : i32
    %32 = vector.broadcast %c32_i32_14 : i32 to vector<16x1xi32>
    %33 = arith.cmpi slt, %23, %32 : vector<16x1xi32>
    %34 = arith.andi %31, %33 : vector<16x1xi1>
    %c0_15 = arith.constant 0 : index
    %c0_16 = arith.constant 0 : index
    %35 = vector.load %arg8[%c0_15, %c0_16] : memref<16x1xf32, #tpu.memory_space<vmem>>, vector<16x1xf32>
    %cst_17 = arith.constant 0.000000e+00 : f32
    %36 = vector.broadcast %cst_17 : f32 to vector<16x1xf32>
    %37 = arith.select %34, %8, %36 : vector<16x1xi1>, vector<16x1xf32>
    %38 = arith.addf %29, %37 : vector<16x1xf32>
    %39 = arith.addf %35, %38 : vector<16x1xf32>
    %c0_18 = arith.constant 0 : index
    %c0_19 = arith.constant 0 : index
    %40 = vector.load %arg8[%c0_18, %c0_19] : memref<16x1xf32, #tpu.memory_space<vmem>>, vector<16x1xf32>
    tpu.vector_store %arg8[%c0_18, %c0_19], %39 {strides = array<i32>} : memref<16x1xf32, #tpu.memory_space<vmem>>, vector<16x1xf32>,
    %c0_20 = arith.constant 0 : index
    %c0_21 = arith.constant 0 : index
    %41 = vector.load %arg6[%c0_20, %c0_21] : memref<16x1xf32, #tpu.memory_space<vmem>>, vector<16x1xf32>
    tpu.vector_store %arg6[%c0_20, %c0_21], %8 {strides = array<i32>} : memref<16x1xf32, #tpu.memory_space<vmem>>, vector<16x1xf32>,
    %c0_i32_22 = arith.constant 0 : i32
    %42 = arith.cmpi eq, %arg1, %c0_i32_22 : i32
    %43 = arith.extui %42 : i1 to i32
    %c0_i32_23 = arith.constant 0 : i32
    %44 = arith.cmpi ne, %43, %c0_i32_23 : i32
    scf.if %44 {
      %c0_24 = arith.constant 0 : index
      %c0_25 = arith.constant 0 : index
      %45 = vector.load %arg6[%c0_24, %c0_25] : memref<16x1xf32, #tpu.memory_space<vmem>>, vector<16x1xf32>
      %c0_26 = arith.constant 0 : index
      %c0_27 = arith.constant 0 : index
      %46 = vector.load %arg7[%c0_26, %c0_27] : memref<16x1xf32, #tpu.memory_space<vmem>>, vector<16x1xf32>
      %47 = math.log %46 : vector<16x1xf32>
      %48 = arith.addf %45, %47 : vector<16x1xf32>
      %c0_28 = arith.constant 0 : index
      %c0_29 = arith.constant 0 : index
      %49 = vector.load %arg8[%c0_28, %c0_29] : memref<16x1xf32, #tpu.memory_space<vmem>>, vector<16x1xf32>
      %50 = arith.subf %48, %49 : vector<16x1xf32>
      %c0_30 = arith.constant 0 : index
      %c0_31 = arith.constant 0 : index
      %51 = vector.load %arg4[%c0_30, %c0_31] : memref<16x1xf32, #tpu.memory_space<vmem>>, vector<16x1xf32>
      %cst_32 = arith.constant 0.000000e+00 : f32
      %52 = vector.broadcast %cst_32 : f32 to vector<16x1xf32>
      %53 = arith.cmpf ogt, %51, %52 : vector<16x1xf32>
      %cst_33 = arith.constant 0.000000e+00 : f32
      %54 = vector.broadcast %cst_33 : f32 to vector<16x1xf32>
      %55 = arith.select %53, %50, %54 : vector<16x1xi1>, vector<16x1xf32>
      %56 = arith.mulf %55, %51 : vector<16x1xf32>
      %57 = vector.shape_cast %56 : vector<16x1xf32> to vector<1x16x1xf32>
      %cst_34 = arith.constant dense<0.000000e+00> : vector<1xf32>
      %58 = vector.multi_reduction <add>, %57, %cst_34 [1, 2] : vector<1x16x1xf32> to vector<1xf32>
      %59 = vector.shape_cast %58 : vector<1xf32> to vector<1x1x1xf32>
      %60 = vector.extract %59[0, 0, 0] : f32 from vector<1x1x1xf32>
      %61 = vector.shape_cast %51 : vector<16x1xf32> to vector<1x16x1xf32>
      %cst_35 = arith.constant dense<0.000000e+00> : vector<1xf32>
      %62 = vector.multi_reduction <add>, %61, %cst_35 [1, 2] : vector<1x16x1xf32> to vector<1xf32>
      %63 = vector.shape_cast %62 : vector<1xf32> to vector<1x1x1xf32>
      %64 = vector.extract %63[0, 0, 0] : f32 from vector<1x1x1xf32>
      %65 = tpu.iota {dimensions = array<i32: 1>} : vector<1x8x128xi32>
      %66 = tpu.iota {dimensions = array<i32: 2>} : vector<1x8x128xi32>
      %c0_i32_36 = arith.constant 0 : i32
      %67 = vector.broadcast %c0_i32_36 : i32 to vector<1x8x128xi32>
      %68 = arith.cmpi eq, %65, %67 : vector<1x8x128xi32>
      %c0_i32_37 = arith.constant 0 : i32
      %69 = vector.broadcast %c0_i32_37 : i32 to vector<1x8x128xi32>
      %70 = arith.cmpi eq, %66, %69 : vector<1x8x128xi32>
      %71 = arith.andi %68, %70 : vector<1x8x128xi1>
      %c0_i32_38 = arith.constant 0 : i32
      %72 = vector.broadcast %c0_i32_38 : i32 to vector<1x8x128xi32>
      %73 = arith.cmpi eq, %65, %72 : vector<1x8x128xi32>
      %c1_i32 = arith.constant 1 : i32
      %74 = vector.broadcast %c1_i32 : i32 to vector<1x8x128xi32>
      %75 = arith.cmpi eq, %66, %74 : vector<1x8x128xi32>
      %76 = arith.andi %73, %75 : vector<1x8x128xi1>
      %cst_39 = arith.constant 0.000000e+00 : f32
      %77 = vector.broadcast %64 : f32 to vector<1x8x128xf32>
      %78 = vector.broadcast %cst_39 : f32 to vector<1x8x128xf32>
      %79 = arith.select %76, %77, %78 : vector<1x8x128xi1>, vector<1x8x128xf32>
      %80 = vector.broadcast %60 : f32 to vector<1x8x128xf32>
      %81 = arith.select %71, %80, %79 : vector<1x8x128xi1>, vector<1x8x128xf32>
      %c0_40 = arith.constant 0 : index
      %c0_41 = arith.constant 0 : index
      %c0_42 = arith.constant 0 : index
      %82 = vector.load %arg5[%c0_40, %c0_41, %c0_42] : memref<1x8x128xf32, #tpu.memory_space<vmem>>, vector<1x8x128xf32>
      tpu.vector_store %arg5[%c0_40, %c0_41, %c0_42], %81 {strides = array<i32>} : memref<1x8x128xf32, #tpu.memory_space<vmem>>, vector<1x8x128xf32>,
    } else {
    }
    return
  }
  func.func @transform_0(%arg0: i32, %arg1: i32) -> (i32, i32) {
    %c0_i32 = arith.constant 0 : i32
    return %arg0, %arg1 : i32, i32
  }
  func.func @transform_1(%arg0: i32, %arg1: i32) -> (i32, i32) {
    %c0_i32 = arith.constant 0 : i32
    %c0_i32_0 = arith.constant 0 : i32
    return %arg0, %c0_i32 : i32, i32
  }
  func.func @transform_2(%arg0: i32, %arg1: i32) -> (i32, i32) {
    %c0_i32 = arith.constant 0 : i32
    %c0_i32_0 = arith.constant 0 : i32
    return %arg0, %c0_i32 : i32, i32
  }
  func.func @transform_3(%arg0: i32, %arg1: i32) -> (i32, i32, i32) {
    %c0_i32 = arith.constant 0 : i32
    %c0_i32_0 = arith.constant 0 : i32
    %c0_i32_1 = arith.constant 0 : i32
    return %arg0, %c0_i32, %c0_i32_0 : i32, i32, i32
  }
}

</mosaic_0001>

<bundles_post_ra>
// kernel: tpu_custom_call.1
= control target key start
LH: loop header
LB: loop body
LE: loop exit
PB: predicated region body
PF: predicated region fallthrough
CT: control target
= control target key end

     0   :  { %vm30_vm0 = vcmask 261120   ;;  %s329_s0 = inlined_call_operand.vmem [shape: f32[16,32], index: 0, kind: input, shape index: {}]   ;;  %s330_s1 = inlined_call_operand.vmem [shape: s32[16,1], index: 1, kind: input, shape index: {}]   ;;  %s331_s2 = inlined_call_operand.vmem [shape: f32[16,1], index: 2, kind: input, shape index: {}]   ;;  %s332_s3 = inlined_call_operand.hbm [shape: f32[1,8,128], index: 3, kind: output, shape index: {}]  }
   0x1   :  { %v26_v0 = vld [vmem:[%s329_s0] sm:$0xff]  ;;  %v27_v1 = vld [vmem:[%s329_s0 + $0x8] sm:$0xff] }
   0x2   :  { %8 = vsyncpa [#allocation6], 0  ;;  %v31_v2 = vsel %vm30_vm0, %v26_v0, -inf  ;;  %v34_v3 = vsel %vm30_vm0, %v27_v1, -inf  ;;  %vm19_vm1 = vcmask 7168   ;;  %v239_v4 = vmov -inf  }
   0x3   :  { %32 = vmax.xlane.f32.xlu0 %v31_v2  ;;  %20 = vst.msk [vmem:[#allocation2] sm:$0xff] %vm19_vm1, %v239_v4  ;;  %21 = vst.msk [vmem:[#allocation2 + $0x8] sm:$0xff] %vm19_vm1, %v239_v4  ;;  %v240_v5 = vmov 0   ;;  %v241_v6 = vmov 0.0   ;;  %v78_v7 = vld [vmem:[%s330_s1] sm:$0xff]  ;;  %v79_v18 = vld [vmem:[%s330_s1 + $0x8] sm:$0xff]  ;;  %v28_v19 = vlaneseq }
   0x4   :  { %201 = vset.pattern.permute.xlu1 %v240_v5  ;;  %202 = vset.pattern.permute.xlu0 %v240_v5  ;;  %24 = vst.msk [vmem:[#allocation4] sm:$0xff] %vm19_vm1, %v241_v6  ;;  %22 = vst.msk [vmem:[#allocation3] sm:$0xff] %vm19_vm1, %v241_v6  ;;  %vm100_vm2 = vcmp.ge.s32.totalorder %v78_v7, 0  ;;  %vm102_vm3 = vcmp.lt.s32.totalorder %v78_v7, 32  ;;  %vm101_vm7 = vcmp.ge.s32.totalorder %v79_v18, 0  ;;  %vm103_vm8 = vcmp.lt.s32.totalorder %v79_v18, 32 }
   0x5   :  { %23 = vst.msk [vmem:[#allocation3 + $0x8] sm:$0xff] %vm19_vm1, %v241_v6  ;;  %25 = vst.msk [vmem:[#allocation4 + $0x8] sm:$0xff] %vm19_vm1, %v241_v6  ;;  %v292_v20 = vand.u32 127, %v28_v19  ;;  %v135_v62 = vld [vmem:[%s331_s2] sm:$0xff]  ;;  %v136_v5 = vld [vmem:[%s331_s2 + $0x8] sm:$0xff]  ;;  %s242_s22 = smov [#allocation5]  }
   0x6   :  { %vm280_vm4 = vmand %vm100_vm2, %vm102_vm3  ;;  %vm137_vm10 = vcmp.gt.f32.partialorder %v135_v62, 0.0  ;;  %vm138_vm11 = vcmp.gt.f32.partialorder %v136_v5, 0.0  ;;  %s185_s23 = sshll.u32 %s242_s22, 4  ;;  %s186_s23 = int_to_ptr.vmem [resolvable:$true] %s185_s23 }
   0x7   :  { %35 = vmax.xlane.f32.xlu0 %v34_v3  ;;  %vm105_vm9 = vmand %vm101_vm7, %vm103_vm8  ;;  %vm172_vm13 = vcmp.eq.s32.totalorder %v292_v20, 1  ;;  %vm170_vm14 = vcmp.eq.s32.totalorder %v292_v20, 0  ;;  %s215_s25 = scalar_lea.vmem %s186_s23, 128  ;;  %p220_p1 = scmp.lt.s32.totalorder %s186_s23, %s186_s23 }
   0x8   :  { %p216_p0 = scmp.ne.s32.totalorder %s186_s23, %s215_s25  ;;  %p221_p2 = scmp.lt.s32.totalorder %s215_s25, %s215_s25 }
   0xa   :  { %v37_v8 = vld [vmem:[#allocation2] sm:$0xff]  ;;  %v38_v12 = vld [vmem:[#allocation2 + $0x8] sm:$0xff]  ;;  %p222_p3 = por %p221_p2, %p220_p1 }
   0xb   :  { %v106_v39 = vld [vmem:[#allocation4] sm:$0xff]  ;;  %v59_v44 = vld [vmem:[#allocation3] sm:$0xff] }
   0xc   :  { %v60_v48 = vld [vmem:[#allocation3 + $0x8] sm:$0xff]  ;;  %v107_v53 = vld [vmem:[#allocation4 + $0x8] sm:$0xff]  ;;  %p223_p4 = pnand %p222_p3, %p216_p0 }
  0x1d   :  { %85 = vperm.xlu0 %202, %v78_v7  }
  0x90   :  { %v33_v9 = vpop.xlane.xlu0 %32 }
  0x91   :  { %v39_v11 = vmax.f32 %v37_v8, %v33_v9 }
  0x93   :  { %v41_v13 = vsub.f32 %v37_v8, %v39_v11  ;;  %116 = vst.msk [vmem:[#allocation2] sm:$0xff] %vm19_vm1, %v39_v11  ;;  %49 = vperm.xlu1 %201, %v39_v11   ;;  %v108_v14 = vsel %vm280_vm4, %v39_v11, 0.0 }
  0x94   :  { %v36_v15 = vpop.xlane.xlu0 %35 }
  0x95   :  { %v40_v16 = vmax.f32 %v38_v12, %v36_v15  ;;  %v43_v37 = vmul.f32 1.442695, %v41_v13 }
  0x97   :  { %v42_v17 = vsub.f32 %v38_v12, %v40_v16  ;;  %117 = vst.msk [vmem:[#allocation2 + $0x8] sm:$0xff] %vm19_vm1, %v40_v16  ;;  %54 = vperm.xlu1 %201, %v40_v16   ;;  %v109_v54 = vsel %vm105_vm9, %v40_v16, 0.0  ;;  %v155_v16 = vsel %vm19_vm1, %v135_v62, 0.0 }
  0x99   :  { %v45_v38 = vmul.f32 1.442695, %v42_v17  ;;  %v156_v17 = vsel %vm19_vm1, %v136_v5, 0.0 }
  0x9a   :  { %v121_v63 = vld [vmem:[#allocation2] sm:$0xff] }
  0x9b   :  { %88 = vperm.xlu1 %201, %v79_v18  }
  0x9c   :  { %v86_v21 = vpop.permute.xlu0 %85 }
  0x9d   :  { %vm90_vm5 = vcmp.eq.s32.totalorder %v292_v20, %v86_v21  ;;  %v157_v21 = vadd.f32 %v156_v17, %v155_v16 }
  0x9e   :  { %v122_v6 = vld [vmem:[#allocation2 + $0x8] sm:$0xff] }
 0x112   :  { %v50_v22 = vpop.permute.xlu1 %49 }
 0x113   :  { %v57_v23 = vsub.f32 %v26_v0, %v50_v22 }
 0x115   :  { %v63_v24 = vmul.f32 1.442695, %v57_v23  ;;  %v92_v25 = vsel %vm90_vm5, %v57_v23, 0.0 }
 0x116   :  { %v55_v26 = vpop.permute.xlu1 %54  ;;  %v94_v27 = vsel %vm30_vm0, %v92_v25, 0.0 }
 0x117   :  { %203 = vpow2.f32 %v63_v24  ;;  %v58_v28 = vsub.f32 %v27_v1, %v55_v26  ;;  %95 = vadd.xlane.f32.xlu0 %v94_v27 }
 0x119   :  { %v65_v29 = vmul.f32 1.442695, %v58_v28 }
 0x11a   :  { %v89_v31 = vpop.permute.xlu1 %88 }
 0x11b   :  { %205 = vpow2.f32 %v65_v29  ;;  %vm91_vm6 = vcmp.eq.s32.totalorder %v292_v20, %v89_v31 }
 0x11c   :  { %v93_v35 = vsel %vm91_vm6, %v58_v28, 0.0  ;;  %207 = vpow2.f32 %v43_v37 }
 0x11d   :  { %v97_v36 = vsel %vm30_vm0, %v93_v35, 0.0  ;;  %209 = vpow2.f32 %v45_v38 }
 0x121   :  { %v204_v30 = vpop.eup %203 }
 0x122   :  { %v67_v32 = vsel %vm30_vm0, %v204_v30, 0.0 }
 0x123   :  { %68 = vadd.xlane.f32.xlu1 %v67_v32 }
 0x125   :  { %v206_v33 = vpop.eup %205 }
 0x126   :  { %v70_v34 = vsel %vm30_vm0, %v206_v33, 0.0  ;;  %v208_v43 = vpop.eup %207 }
 0x127   :  { %71 = vadd.xlane.f32.xlu1 %v70_v34  ;;  %v61_v45 = vmul.f32 %v208_v43, %v59_v44  ;;  %v210_v46 = vpop.eup %209 }
 0x128   :  { %v62_v50 = vmul.f32 %v210_v46, %v60_v48 }
 0x12b   :  { %98 = vadd.xlane.f32.xlu1 %v97_v36  ;;  %v168_v36 = vshrl.u32 %v28_v19, 7 }
 0x12d   :  { %vm169_vm12 = vcmp.eq.s32.totalorder %v168_v36, 0 }
 0x12e   :  { %vm173_vm15 = vmand %vm169_vm12, %vm172_vm13 }
 0x12f   :  { %vm171_vm0 = vmand %vm169_vm12, %vm170_vm14 }
 0x1a4   :  { %v96_v40 = vpop.xlane.xlu0 %95 }
 0x1a5   :  { %v110_v41 = vadd.f32 %v108_v14, %v96_v40 }
 0x1a7   :  { %v112_v42 = vadd.f32 %v110_v41, %v106_v39 }
 0x1a9   :  { %114 = vst.msk [vmem:[#allocation4] sm:$0xff] %vm19_vm1, %v112_v42 }
 0x1b0   :  { %v69_v47 = vpop.xlane.xlu1 %68  ;;  %v131_v2 = vld [vmem:[#allocation4] sm:$0xff] }
 0x1b1   :  { %v73_v49 = vadd.f32 %v69_v47, %v61_v45 }
 0x1b3   :  { %76 = vst.msk [vmem:[#allocation3] sm:$0xff] %vm19_vm1, %v73_v49 }
 0x1b4   :  { %v72_v51 = vpop.xlane.xlu1 %71 }
 0x1b5   :  { %v74_v52 = vadd.f32 %v72_v51, %v62_v50 }
 0x1b7   :  { %77 = vst.msk [vmem:[#allocation3 + $0x8] sm:$0xff] %vm19_vm1, %v74_v52 }
 0x1b8   :  { %v99_v55 = vpop.xlane.xlu1 %98 }
 0x1b9   :  { %v111_v56 = vadd.f32 %v109_v54, %v99_v55 }
 0x1ba   :  { %v123_v57 = vld [vmem:[#allocation3] sm:$0xff] }
 0x1bb   :  { %v113_v58 = vadd.f32 %v111_v56, %v107_v53  ;;  %211 = vlog2.f32 %v123_v57 }
 0x1bd   :  { %115 = vst.msk [vmem:[#allocation4 + $0x8] sm:$0xff] %vm19_vm1, %v113_v58 }
 0x1be   :  { %v124_v59 = vld [vmem:[#allocation3 + $0x8] sm:$0xff] }
 0x1bf   :  { %213 = vlog2.f32 %v124_v59 }
 0x1c4   :  { %v132_v9 = vld [vmem:[#allocation4 + $0x8] sm:$0xff] }
 0x1c5   :  { %v212_v60 = vpop.eup %211 }
 0x1c6   :  { %v126_v61 = vmul.f32 0.6931472, %v212_v60 }
 0x1c8   :  { %v129_v0 = vadd.f32 %v126_v61, %v121_v63 }
 0x1c9   :  { %v214_v1 = vpop.eup %213 }
 0x1ca   :  { %v128_v3 = vmul.f32 0.6931472, %v214_v1  ;;  %v133_v4 = vsub.f32 %v129_v0, %v131_v2 }
 0x1cc   :  { %v130_v7 = vadd.f32 %v128_v3, %v122_v6  ;;  %v139_v8 = vsel %vm137_vm10, %v133_v4, 0.0 }
 0x1cd   :  { %v141_v11 = vmul.f32 %v139_v8, %v135_v62 }
 0x1ce   :  { %v134_v10 = vsub.f32 %v130_v7, %v132_v9 }
 0x1cf   :  { %v143_v14 = vsel %vm19_vm1, %v141_v11, 0.0 }
 0x1d0   :  { %v140_v12 = vsel %vm138_vm11, %v134_v10, 0.0 }
 0x1d1   :  { %v142_v13 = vmul.f32 %v140_v12, %v136_v5 }
 0x1d3   :  { %v144_v15 = vsel %vm19_vm1, %v142_v13, 0.0 }
 0x1d4   :  { %v145_v18 = vadd.f32 %v144_v15, %v143_v14 }
 0x1d6   :  { %146 = vadd.xlane.f32.xlu1 %v145_v18 }
 0x1da   :  { %158 = vadd.xlane.f32.xlu1 %v157_v21 }
 0x263   :  { %v147_v22 = vpop.xlane.xlu1 %146 }
 0x264   :  { %v148_v23 = vrot.slane %v147_v22, 4 }
 0x266   :  { %v149_v24 = vadd.f32 %v148_v23, %v147_v22 }
 0x267   :  { %v159_v25 = vpop.xlane.xlu1 %158 }
 0x268   :  { %v150_v26 = vrot.slane %v149_v24, 2  ;;  %v160_v27 = vrot.slane %v159_v25, 4 }
 0x26a   :  { %v161_v28 = vadd.f32 %v160_v27, %v159_v25  ;;  %v151_v29 = vadd.f32 %v150_v26, %v149_v24 }
 0x26c   :  { %v162_v30 = vrot.slane %v161_v28, 2  ;;  %v152_v31 = vrot.slane %v151_v29, 1 }
 0x26e   :  { %v163_v32 = vadd.f32 %v162_v30, %v161_v28  ;;  %v153_v33 = vadd.f32 %v152_v31, %v151_v29 }
 0x270   :  { %193 = vpush %v153_v33  ;;  %v164_v34 = vrot.slane %v163_v32, 1 }
 0x272   :  { %v165_v35 = vadd.f32 %v164_v34, %v163_v32 }
 0x274   :  { %195 = vpush %v165_v35 }
 0x2a1   :  { %s194_s2 = spop %193 }
 0x2a2   :  { %v176_v38 = vstv %s194_s2 }
 0x2a5   :  { %s196_s24 = spop %195 }
 0x2a6   :  { %v174_v37 = vstv %s196_s24 }
 0x2a7   :  { %v175_v39 = vsel %vm173_vm15, %v174_v37, 0.0 }
 0x2a8   :  { %v177_v40 = vsel %vm171_vm0, %v176_v38, %v175_v39 }
 0x2a9   :  { %178 = vst [vmem:[#allocation5] sm:$0xff] %v177_v40 }
 0x2aa   :  { %226 = shalt.err (!%p223_p4)
}
 0x2ab   :  { %s227_s28 = scalar_lea.hbm %s332_s3, 128 }
 0x2ac   :  { %p228_p5 = scmp.ne.s32.totalorder %s332_s3, %s227_s28  ;;  %p231_p6 = scmp.lt.u32.totalorder %s227_s28, %s332_s3 }
 0x2ae   :  { %p233_p7 = pnand %p231_p6, %p228_p5 }
 0x2b0   :  { %236 = shalt.err (!%p233_p7)
}
 0x2b1   :  { %188 = dma.vmem_to_hbm [thread:$0]  %s186_s23, 128, %s332_s3, [#allocation6]  }
 0x2b2   :  { %237 = dma.done.wait [#allocation6], 128  }
 0x2b3   :  { %238 = vsyncadd [#allocation6], 4294967168 }
 0x2b4   :  { %192 = vsyncpa [#allocation6], 1 }

</bundles_post_ra>
